<compile_context>
chip_gen: v5e
topology: v5e:2x2
jax: 0.10.0
libtpu: 0.0.40
codegen_flags: <defaults>
</compile_context>

<pallas_src>
import jax
import jax.numpy as jnp
from jax import lax
from jax.experimental import pallas as pl
from jax.experimental.pallas import tpu as pltpu


def _pooler_kernel(x_ref, w_ref, b_ref, o_ref):
    # x_ref: (B, H_in)   bf16 first-token activations (resident across the grid)
    # w_ref: (tn, H_in)  bf16 weight tile in the native (H_out, H_in) layout
    # b_ref: (1, tn)     f32 bias tile
    # o_ref: (B, tn)     output tile
    # (B, H_in) x (tn, H_in) contracted on the last dims -> (B, tn) == x @ W.T
    y = lax.dot_general(
        x_ref[...], w_ref[...],
        dimension_numbers=(((1,), (1,)), ((), ())),
        preferred_element_type=jnp.float32)
    y = y + b_ref[...]                          # f32 epilogue (v5e has no bf16 VPU/EUP)
    o_ref[...] = jnp.tanh(y).astype(o_ref.dtype)


def prepare_pooler_params(weight, bias):
    """Hoisted weight prep: call once at param-load time, NOT per forward.

    weight: (H_out, H_in) f32 PyTorch nn.Linear layout; bias: (H_out,).
    Returns (bf16 weight, (1, H_out) f32 bias) ready to feed bert_pooler.
    """
    w_bf16 = jnp.asarray(weight, dtype=jnp.bfloat16)
    b2d = jnp.asarray(bias, dtype=jnp.float32).reshape(1, -1)
    return w_bf16, b2d


def _detect_num_cores():
    """TensorCores per chip (2 on v7x, 1 on v5e/v6e). Safe fallback = 1."""
    try:
        return max(1, min(2, int(getattr(jax.devices()[0], "num_cores", 1) or 1)))
    except Exception:
        return 1


def _pick_tile_n(h_out, h_in, *, num_cores=1,
                 single_block_budget=12 * 1024 * 1024,
                 tile_budget=8 * 1024 * 1024):
    """Choose the H_out tile width (weight is bf16 = 2 bytes/elem).

    Single-TC chips: one full-width resident block whenever it fits (one DMA,
    zero grid-step overhead — the per-tile compute here is too small to hide
    behind a pipeline anyway).  Dual-TC (v7x): exactly 2 balanced tiles so the
    "parallel" grid axis splits the weight stream evenly.  Fall back to the
    largest 128-multiple tile that fits double-buffered.
    """
    w_bytes = h_out * h_in * 2
    if num_cores <= 1 and w_bytes <= single_block_budget:
        return h_out
    if num_cores >= 2 and h_out % 2 == 0:
        half = h_out // 2
        if half % 128 == 0 and 2 * half * h_in * 2 <= tile_budget:
            return half
    for tn in (1024, 512, 384, 256, 128):
        if h_out % tn == 0 and 2 * tn * h_in * 2 <= tile_budget:
            return tn
    return h_out


def _vmem_limit_bytes(B, h_in, tn, out_itemsize):
    """Explicit scoped-VMEM budget for the actual buffers (+ headroom)."""
    w_buf = 2 * tn * h_in * 2            # double-buffered bf16 weight tile
    x_buf = 2 * max(B, 8) * h_in * 2     # resident bf16 x (sublane-padded)
    b_buf = 2 * 8 * tn * 4               # bias tile (sublane-padded)
    o_buf = 2 * max(B, 8) * tn * out_itemsize
    needed = w_buf + x_buf + b_buf + o_buf
    return int(min(64 << 20, max(16 << 20, needed + (4 << 20))))


def bert_pooler(hidden_states, w_bf16, b2d, *, num_cores=None, force_tn=None):
    """hidden_states: (B, S, H_in); w_bf16/b2d from prepare_pooler_params()."""
    B, S, H_in = hidden_states.shape
    H_out, H_in_w = w_bf16.shape
    assert H_in_w == H_in and b2d.shape == (1, H_out)

    if num_cores is None:
        num_cores = _detect_num_cores()

    # Tiny wrapper-side op (B*H_in elements): dense first-token slice + bf16
    # cast. Negligible vs the H_out*H_in weight stream the kernel is bound by.
    x0 = hidden_states[:, 0, :].astype(jnp.bfloat16)

    tn = force_tn if force_tn is not None else _pick_tile_n(
        H_out, H_in, num_cores=num_cores)
    assert H_out % tn == 0
    n_tiles = H_out // tn
    grid = (n_tiles,)

    cost = pl.CostEstimate(
        flops=2 * B * H_in * H_out,
        transcendentals=B * H_out,
        bytes_accessed=(H_out * H_in * 2                  # bf16 weight (dominant)
                        + B * H_in * 2                    # bf16 first-token x
                        + H_out * 4                       # f32 bias
                        + B * H_out * hidden_states.dtype.itemsize))

    return pl.pallas_call(
        _pooler_kernel,
        out_shape=jax.ShapeDtypeStruct((B, H_out), hidden_states.dtype),
        grid=grid,
        in_specs=[
            # Same block index for every j => x fetched once, resident.
            pl.BlockSpec((B, H_in), lambda j: (0, 0)),
            # Weight streamed tile-by-tile along H_out in its native layout,
            # double-buffered by the Pallas pipeline when n_tiles > 1.
            pl.BlockSpec((tn, H_in), lambda j: (j, 0)),
            pl.BlockSpec((1, tn), lambda j: (0, j)),
        ],
        out_specs=pl.BlockSpec((B, tn), lambda j: (0, j)),
        compiler_params=pltpu.CompilerParams(
            # Shards weight tiles across v7x's 2 TCs; harmless on v5e/v6e.
            dimension_semantics=("parallel",),
            vmem_limit_bytes=_vmem_limit_bytes(
                B, H_in, tn, hidden_states.dtype.itemsize)),
        cost_estimate=cost,
    )(x0, w_bf16, b2d)


if __name__ == "__main__":
    key = jax.random.PRNGKey(0)

    def run_case(B, S, H, force_tn=None):
        k_h, k_w, k_b = jax.random.split(
            jax.random.fold_in(key, H * 131 + (force_tn or 0)), 3)
        hidden_states = jax.random.normal(k_h, (B, S, H), dtype=jnp.float32)
        # nn.Linear(H, H): weight (H_out, H_in), bias (H_out,)
        weight = jax.random.normal(k_w, (H, H), dtype=jnp.float32) * 0.02
        bias = jax.random.normal(k_b, (H,), dtype=jnp.float32) * 0.02

        # One-time weight prep (hoisted out of the per-call path).
        w_bf16, b2d = prepare_pooler_params(weight, bias)

        out = jax.block_until_ready(
            bert_pooler(hidden_states, w_bf16, b2d, force_tn=force_tn))
        ref = jnp.tanh(hidden_states[:, 0] @ weight.T + bias)
        assert out.shape == (B, H)
        # bf16 matmul operands with f32 accumulate/epilogue -> modest tolerance.
        assert jnp.allclose(out, ref, atol=2e-2, rtol=2e-2), (
            float(jnp.max(jnp.abs(out - ref))))

    run_case(B=2, S=8, H=32)                  # spec-sized shape, single-block path
    run_case(B=2, S=8, H=256)                 # single resident weight block
    run_case(B=2, S=8, H=256, force_tn=128)   # exercises tiled / pipelined H_out path

    print("KERNEL_OK")
</pallas_src>

<mosaic_0001>
module attributes {stable_mosaic.version = 11 : i64} {
  func.func @_pooler_kernel(%arg0: i32, %arg1: memref<2x32xbf16, #tpu.memory_space<vmem>>, %arg2: memref<32x32xbf16, #tpu.memory_space<vmem>>, %arg3: memref<1x32xf32, #tpu.memory_space<vmem>>, %arg4: memref<2x32xf32, #tpu.memory_space<vmem>>) attributes {dimension_semantics = [#tpu.dimension_semantics<parallel>], iteration_bounds = array<i64: 1>, scalar_prefetch = 0 : i64, scratch_operands = 0 : i64, tpu.core_type = #tpu.core_type<tc>, window_params = [{pipeline_mode = #tpu.pipeline_mode<synchronous>, transform_indices = @transform_0, window_bounds = array<i64: 2, 32>}, {transform_indices = @transform_1, window_bounds = array<i64: 32, 32>}, {transform_indices = @transform_2, window_bounds = array<i64: 1, 32>}, {transform_indices = @transform_3, window_bounds = array<i64: 2, 32>}]} {
    %c0 = arith.constant 0 : index
    %c0_0 = arith.constant 0 : index
    %0 = vector.load %arg1[%c0, %c0_0] : memref<2x32xbf16, #tpu.memory_space<vmem>>, vector<2x32xbf16>
    %c0_1 = arith.constant 0 : index
    %c0_2 = arith.constant 0 : index
    %1 = vector.load %arg2[%c0_1, %c0_2] : memref<32x32xbf16, #tpu.memory_space<vmem>>, vector<32x32xbf16>
    %cst = arith.constant dense<0.000000e+00> : vector<2x32xf32>
    %2 = tpu.matmul %0, %1, %cst {dimension_numbers = #tpu.dot_dimension_numbers<[1], [1], [0], [0], [0, 0, 1, 0], [], []>} : vector<2x32xbf16>, vector<32x32xbf16>, vector<2x32xf32> -> vector<2x32xf32>
    %c0_3 = arith.constant 0 : index
    %c0_4 = arith.constant 0 : index
    %3 = vector.load %arg3[%c0_3, %c0_4] : memref<1x32xf32, #tpu.memory_space<vmem>>, vector<1x32xf32>
    %4 = vector.broadcast %3 : vector<1x32xf32> to vector<2x32xf32>
    %5 = arith.addf %2, %4 : vector<2x32xf32>
    %6 = math.tanh %5 : vector<2x32xf32>
    %c0_5 = arith.constant 0 : index
    %c0_6 = arith.constant 0 : index
    %7 = vector.load %arg4[%c0_5, %c0_6] : memref<2x32xf32, #tpu.memory_space<vmem>>, vector<2x32xf32>
    tpu.vector_store %arg4[%c0_5, %c0_6], %6 {strides = array<i32>} : memref<2x32xf32, #tpu.memory_space<vmem>>, vector<2x32xf32>,
    return
  }
  func.func @transform_0(%arg0: i32) -> (i32, i32) {
    %c0_i32 = arith.constant 0 : i32
    %c0_i32_0 = arith.constant 0 : i32
    %c0_i32_1 = arith.constant 0 : i32
    return %c0_i32, %c0_i32_0 : i32, i32
  }
  func.func @transform_1(%arg0: i32) -> (i32, i32) {
    %c0_i32 = arith.constant 0 : i32
    %c0_i32_0 = arith.constant 0 : i32
    return %arg0, %c0_i32 : i32, i32
  }
  func.func @transform_2(%arg0: i32) -> (i32, i32) {
    %c0_i32 = arith.constant 0 : i32
    %c0_i32_0 = arith.constant 0 : i32
    return %c0_i32, %arg0 : i32, i32
  }
  func.func @transform_3(%arg0: i32) -> (i32, i32) {
    %c0_i32 = arith.constant 0 : i32
    %c0_i32_0 = arith.constant 0 : i32
    return %c0_i32, %arg0 : i32, i32
  }
}

</mosaic_0001>

<bundles_post_ra>
// kernel: tpu_custom_call.1
= control target key start
LH: loop header
LB: loop body
LE: loop exit
PB: predicated region body
PF: predicated region fallthrough
CT: control target
= control target key end

     0   :  { %8 = vsyncpa [#allocation3], 0  ;;  %s243_s0 = inlined_call_operand.hbm [shape: bf16[2,32], index: 0, kind: input, shape index: {}]   ;;  %s244_s1 = inlined_call_operand.hbm [shape: bf16[32,32], index: 1, kind: input, shape index: {}]   ;;  %s245_s2 = inlined_call_operand.vmem [shape: f32[1,32], index: 2, kind: input, shape index: {}]   ;;  %s246_s3 = inlined_call_operand.hbm [shape: f32[2,32], index: 3, kind: output, shape index: {}]  }
   0x1   :  { %9 = vsyncpa [#allocation6], 0 }
   0x2   :  { %10 = vsyncpa [#allocation4], 0  ;;  %s16_s14 = sshll.u32 %s243_s0, 4  ;;  %s206_s15 = smov [#allocation2]   ;;  %s17_s14 = int_to_ptr.hbm [resolvable:$true] %s16_s14 }
   0x3   :  { %s18_s16 = sshll.u32 %s206_s15, 4  ;;  %s26_s19 = sshll.u32 %s244_s1, 4  ;;  %s19_s16 = int_to_ptr.vmem [resolvable:$true] %s18_s16  ;;  %s27_s19 = int_to_ptr.hbm [resolvable:$true] %s26_s19 }
   0x4   :  { %21 = dma.hbm_to_vmem [thread:$0]  %s17_s14, 16, %s19_s16, [#allocation3]  }
   0x5   :  { %s207_s20 = smov [#allocation5]   ;;  %s208_s22 = smov 64  }
   0x6   :  { %s28_s21 = sshll.u32 %s207_s20, 4  ;;  %s209_s23 = smov 4   ;;  %s29_s21 = int_to_ptr.vmem [resolvable:$true] %s28_s21 }
   0x7   :  { %34 = dma.hbm_to_vmem [thread:$0]  %s27_s19, 256, %s29_s21, [#allocation6], %s208_s22, %s208_s22, %s209_s23  }
   0x8   :  { %200 = dma.done.wait [#allocation3], 16  }
   0x9   :  { %201 = vsyncadd [#allocation3], 4294967280 }
   0xa   :  { %202 = dma.done.wait [#allocation6], 256  }
   0xb   :  { %203 = vsyncadd [#allocation6], 4294967040  ;;  %vm65_vm0 = vcmask 261120   ;;  %v119_v0 = vld [vmem:[#allocation5 + $0x8] sm:$0xff]  ;;  %v118_v2 = vld [vmem:[#allocation5] sm:$0xff]  ;;  %s210_s24 = smov [#allocation7]  }
   0xc   :  { %v73_v1 = vsel %vm65_vm0, %v119_v0, 0  ;;  %v70_v3 = vsel %vm65_vm0, %v118_v2, 0  ;;  %v46_v4 = vld [vmem:[#allocation2] sm:$0x1]  ;;  %s96_s25 = sshll.u32 %s210_s24, 4  ;;  %s98_s28 = sshll.u32 %s246_s3, 4  ;;  %s97_s25 = int_to_ptr.vmem [resolvable:$true] %s96_s25  ;;  %s99_s28 = int_to_ptr.hbm [resolvable:$true] %s98_s28 }
   0xd   :  { %81 = vmatpush.bf16.xpose.msra.mxu0 %v73_v1  ;;  %v125_v5 = vld [vmem:[%s245_s2] ss:$0 sm:$0xff]  ;;  %vm89_vm1 = vcmask 254976  }
  0x15   :  { %82 = vmatpush.bf16.xpose.msra.mxu0 %v70_v3 }
  0x1c   :  { %117 = vmatmul.msk.bf16.vlgmr.msra.gmra.mxu0 %vm65_vm0, %v46_v4 }
  0x99   :  { %v84_v6 = vpop.f32.mrf.mxu0 }
  0x9a   :  { %v85_v7 = vadd.f32 %v125_v5, %v84_v6 }
  0x9c   :  { %126 = vtanh.f32 %v85_v7 }
  0xa1   :  { %v86_v8 = vpop.f32.mrf.mxu0 }
  0xa2   :  { %v127_v9 = vpop.eup %126 }
  0xa3   :  { %90 = vst.msk [vmem:[#allocation7] sm:$0x3] %vm89_vm1, %v127_v9 }
  0xa4   :  { %101 = dma.vmem_to_hbm [thread:$0]  %s97_s25, 32, %s99_s28, [#allocation4]  }
  0xa5   :  { %204 = dma.done.wait [#allocation4], 32  }
  0xa6   :  { %205 = vsyncadd [#allocation4], 4294967264 }
  0xa7   :  { %106 = vsyncpa [#allocation3], 1 }
  0xa8   :  { %107 = vsyncpa [#allocation6], 1 }
  0xa9   :  { %108 = vsyncpa [#allocation4], 1 }

</bundles_post_ra>
